<compile_context>
chip_gen: v7x
topology: tpu7x:2x2x1
jax: 0.10.0
libtpu: 0.0.40
codegen_flags: <defaults>
</compile_context>

<pallas_src>
import jax
import jax.numpy as jnp
from jax.experimental import pallas as pl
from jax.experimental.pallas import tpu as pltpu

# Model hyper-parameters.  The forecast path applies self.linear twice, which
# is only shape-consistent when pred_len == seq_len (asserted below).
SEQ_LEN = 8
PRED_LEN = 8
CHANNELS = 4
BATCH = 2

# BandPassFilter(10, 1000) constants.
# TODO(synk): BandPassFilter source is not provided; assumed implementation is
# FFT along the time axis with an fs=4000 Hz frequency-bin mask keeping
# |f| in [10, 1000] Hz, returning the (complex) filtered spectrum.
BPF_LOW, BPF_HIGH, BPF_FS = 10.0, 1000.0, 4000.0


def _hybrid_ts_kernel(x_ref, w_ref, b_ref, o_ref):
    """Single gridless invocation over the whole batch.

    x_ref: (L, 3*B*C)  fused branch operand: [real | abs | angle] chunks along
                       the lane axis, each chunk flattened as (batch, channel);
                       time (the contraction dim) sits on sublanes.
    w_ref: (P, L)      Linear(seq_len, pred_len) weight.
    b_ref: (P, 1)      bias as a column (broadcasts along lanes).
    o_ref: (P, B*C)    single lane-dense output slab (wrapper reshapes to
                       dec_out layout (B, P, C)).
    """
    bc = o_ref.shape[1]            # B*C lanes per branch chunk
    w = w_ref[...]                 # (P, L)
    b = b_ref[...]                 # (P, 1) -- loaded once, reused by both dots

    # ONE fused first-layer matmul: covers all three Linear+ReLU branches and
    # the whole batch in a single MXU push.
    h = jnp.maximum(
        jnp.dot(w, x_ref[...], preferred_element_type=jnp.float32) + b,
        0.0)                                                   # (P, 3*B*C)

    # Branch sum: three static lane chunks of the same vreg (negligible VALU
    # work at these widths; see header comment for why not reshape/roll).
    s = h[:, 0:bc] + h[:, bc:2 * bc] + h[:, 2 * bc:3 * bc]     # (P, B*C)

    # Second Linear+ReLU (valid because pred_len == seq_len); one lane-dense
    # store of the whole result slab.
    o_ref[...] = jnp.maximum(
        jnp.dot(w, s, preferred_element_type=jnp.float32) + b,
        0.0)                                                   # (P, B*C)


def hybrid_ts_forward(x_enc, weight, bias,
                      x_mark_enc=None, x_dec=None, x_mark_dec=None):
    """Equivalent of Model.forward with task_name='long_term_forecast'."""
    B, L, C = x_enc.shape
    P = weight.shape[0]
    # Double application of self.linear requires pred_len == seq_len.
    assert P == L, "HybridTS forecast path requires pred_len == seq_len"

    # ---- BandPassFilter: FFT along time + frequency mask (JAX glue). ----
    # TODO(synk): FFT has no clean Pallas TPU equivalent; kept in plain JAX.
    freqs = jnp.fft.fftfreq(L, d=1.0 / BPF_FS)
    mask = (jnp.abs(freqs) >= BPF_LOW) & (jnp.abs(freqs) <= BPF_HIGH)
    xf = jnp.fft.fft(x_enc.astype(jnp.complex64), axis=1)
    xf = xf * mask.astype(jnp.complex64)[None, :, None]          # (B, L, C) complex

    # real / abs / angle branches.
    # TODO(synk): angle (atan2) lowering in Mosaic is not guaranteed; kept as glue.
    re = jnp.real(xf).astype(jnp.float32)
    ab = jnp.abs(xf).astype(jnp.float32)
    ang = jnp.angle(xf).astype(jnp.float32)

    # Fold (branch, batch, channel) onto the lane axis -> one (L, 3*B*C) slab,
    # one input DMA, one fused first-layer dot in the kernel.
    x2d = jnp.transpose(jnp.stack([re, ab, ang], axis=0),        # (3, B, L, C)
                        (2, 0, 1, 3)).reshape(L, 3 * B * C)      # (L, 3*B*C)

    w = weight.astype(jnp.float32)                               # (P, L)
    b_col = bias.reshape(P, 1).astype(jnp.float32)               # (P, 1)

    out2d = pl.pallas_call(
        _hybrid_ts_kernel,
        out_shape=jax.ShapeDtypeStruct((P, B * C), jnp.float32),
        # Gridless: single invocation, full arrays resident in VMEM (footprint
        # is a few KB -- orders of magnitude under any generation's VMEM).
        in_specs=[
            pl.BlockSpec(memory_space=pltpu.MemorySpace.VMEM),   # x2d
            pl.BlockSpec(memory_space=pltpu.MemorySpace.VMEM),   # weight
            pl.BlockSpec(memory_space=pltpu.MemorySpace.VMEM),   # bias column
        ],
        out_specs=pl.BlockSpec(memory_space=pltpu.MemorySpace.VMEM),
    )(x2d, w, b_col)

    # Un-fold the lane axis back to dec_out layout (B, P, C).
    dec_out = jnp.transpose(out2d.reshape(P, B, C), (1, 0, 2))   # (B, P, C)

    # Final slice is a no-op here (pred_len == full extent) but kept for
    # semantic fidelity with the PyTorch forward.
    return dec_out[:, -P:, :]


def _reference_forward(x_enc, weight, bias):
    """Pure-JAX reference for the same forecast path (for sanity check)."""
    B, L, C = x_enc.shape
    P = weight.shape[0]
    freqs = jnp.fft.fftfreq(L, d=1.0 / BPF_FS)
    mask = (jnp.abs(freqs) >= BPF_LOW) & (jnp.abs(freqs) <= BPF_HIGH)
    xf = jnp.fft.fft(x_enc.astype(jnp.complex64), axis=1)
    xf = xf * mask.astype(jnp.complex64)[None, :, None]

    def lin(v):  # (B, C, L) -> (B, C, P)
        return jax.nn.relu(jnp.einsum("bcl,pl->bcp", v, weight) + bias)

    xr = jnp.transpose(jnp.real(xf).astype(jnp.float32), (0, 2, 1))
    xa = jnp.transpose(jnp.abs(xf).astype(jnp.float32), (0, 2, 1))
    xg = jnp.transpose(jnp.angle(xf).astype(jnp.float32), (0, 2, 1))
    x3 = lin(lin(xr) + lin(xa) + lin(xg))
    dec_out = jnp.transpose(x3, (0, 2, 1))
    return dec_out[:, -P:, :]


if __name__ == "__main__":
    key = jax.random.PRNGKey(0)
    kx, kw, kb = jax.random.split(key, 3)

    # Deterministic synthetic parameters (shapes from Model.__init__):
    # nn.Linear(seq_len, pred_len): weight (P, L), bias (P,)
    weight = (jax.random.normal(kw, (PRED_LEN, SEQ_LEN), jnp.float32)
              * (1.0 / jnp.sqrt(SEQ_LEN)))
    bias = jax.random.normal(kb, (PRED_LEN,), jnp.float32) * 0.1

    # Inputs: x_enc (B, L, C); the other forward args are unused by forecast.
    x_enc = jax.random.normal(kx, (BATCH, SEQ_LEN, CHANNELS), jnp.float32)
    x_mark_enc = jnp.zeros((BATCH, SEQ_LEN, 4), jnp.float32)
    x_dec = jnp.zeros((BATCH, PRED_LEN, CHANNELS), jnp.float32)
    x_mark_dec = jnp.zeros((BATCH, PRED_LEN, 4), jnp.float32)

    out = jax.jit(hybrid_ts_forward)(
        x_enc, weight, bias, x_mark_enc, x_dec, x_mark_dec)
    jax.block_until_ready(out)

    ref = _reference_forward(x_enc, weight, bias)
    assert out.shape == (BATCH, PRED_LEN, CHANNELS), out.shape
    assert jnp.allclose(out, ref, atol=1e-4, rtol=1e-4), "mismatch vs reference"

    print("KERNEL_OK")
</pallas_src>

<mosaic_0001>
module attributes {stable_mosaic.version = 11 : i64} {
  func.func @_hybrid_ts_kernel(%arg0: memref<8x24xf32, #tpu.memory_space<vmem>>, %arg1: memref<8x8xf32, #tpu.memory_space<vmem>>, %arg2: memref<8x1xf32, #tpu.memory_space<vmem>>, %arg3: memref<8x8xf32, #tpu.memory_space<vmem>>) attributes {dimension_semantics = [], scalar_prefetch = 0 : i64, scratch_operands = 0 : i64, tpu.core_type = #tpu.core_type<tc>} {
    %c0 = arith.constant 0 : index
    %c0_0 = arith.constant 0 : index
    %0 = vector.load %arg1[%c0, %c0_0] : memref<8x8xf32, #tpu.memory_space<vmem>>, vector<8x8xf32>
    %c0_1 = arith.constant 0 : index
    %c0_2 = arith.constant 0 : index
    %1 = vector.load %arg2[%c0_1, %c0_2] : memref<8x1xf32, #tpu.memory_space<vmem>>, vector<8x1xf32>
    %c0_3 = arith.constant 0 : index
    %c0_4 = arith.constant 0 : index
    %2 = vector.load %arg0[%c0_3, %c0_4] : memref<8x24xf32, #tpu.memory_space<vmem>>, vector<8x24xf32>
    %cst = arith.constant dense<0.000000e+00> : vector<8x24xf32>
    %3 = tpu.matmul %0, %2, %cst {dimension_numbers = #tpu.dot_dimension_numbers<[1], [0], [0], [1], [0, 0, 1, 1], [], []>} : vector<8x8xf32>, vector<8x24xf32>, vector<8x24xf32> -> vector<8x24xf32>
    %4 = vector.broadcast %1 : vector<8x1xf32> to vector<8x24xf32>
    %5 = arith.addf %3, %4 : vector<8x24xf32>
    %cst_5 = arith.constant 0.000000e+00 : f32
    %6 = vector.broadcast %cst_5 : f32 to vector<8x24xf32>
    %7 = arith.maximumf %5, %6 : vector<8x24xf32>
    %8 = vector.extract_strided_slice %7 {offsets = [0, 0], sizes = [8, 8], strides = [1, 1]} : vector<8x24xf32> to vector<8x8xf32>
    %9 = vector.extract_strided_slice %7 {offsets = [0, 8], sizes = [8, 8], strides = [1, 1]} : vector<8x24xf32> to vector<8x8xf32>
    %10 = arith.addf %8, %9 : vector<8x8xf32>
    %11 = vector.extract_strided_slice %7 {offsets = [0, 16], sizes = [8, 8], strides = [1, 1]} : vector<8x24xf32> to vector<8x8xf32>
    %12 = arith.addf %10, %11 : vector<8x8xf32>
    %cst_6 = arith.constant dense<0.000000e+00> : vector<8x8xf32>
    %13 = tpu.matmul %0, %12, %cst_6 {dimension_numbers = #tpu.dot_dimension_numbers<[1], [0], [0], [1], [0, 0, 1, 1], [], []>} : vector<8x8xf32>, vector<8x8xf32>, vector<8x8xf32> -> vector<8x8xf32>
    %14 = vector.broadcast %1 : vector<8x1xf32> to vector<8x8xf32>
    %15 = arith.addf %13, %14 : vector<8x8xf32>
    %cst_7 = arith.constant 0.000000e+00 : f32
    %16 = vector.broadcast %cst_7 : f32 to vector<8x8xf32>
    %17 = arith.maximumf %15, %16 : vector<8x8xf32>
    %c0_8 = arith.constant 0 : index
    %c0_9 = arith.constant 0 : index
    %18 = vector.load %arg3[%c0_8, %c0_9] : memref<8x8xf32, #tpu.memory_space<vmem>>, vector<8x8xf32>
    tpu.vector_store %arg3[%c0_8, %c0_9], %17 {strides = array<i32>} : memref<8x8xf32, #tpu.memory_space<vmem>>, vector<8x8xf32>,
    return
  }
}

</mosaic_0001>

<bundles_post_ra>
// kernel: hybrid_ts_forward.1
= control target key start
LH: loop header
LB: loop body
LE: loop exit
PB: predicated region body
PF: predicated region fallthrough
CT: control target
= control target key end

     0   :  { %vm22_vm0 = vcmask 64512   ;;  %v204_v0 = vmov 0.0   ;;  %vm205_vm1 = vmmov 0   ;;  %v206_v4 = vmov 0   ;;  %s244_s0 = inlined_call_operand.vmem [shape: f32[8,24], index: 0, kind: input, shape index: {}]   ;;  %s245_s1 = inlined_call_operand.vmem [shape: f32[8,8], index: 1, kind: input, shape index: {}]   ;;  %s246_s2 = inlined_call_operand.vmem [shape: f32[8,1], index: 2, kind: input, shape index: {}]   ;;  %s247_s3 = inlined_call_operand.vmem [shape: f32[8,8], index: 3, kind: output, shape index: {}]  }
   0x1   :  { %188 = vmatprep.subr.mxu0 %v204_v0  ;;  %v16_v1 = vld [vmem:[%s244_s0] sm:$0xff]  ;;  %190 = vmatprep.mubr.msk.f32.mxu0 %vm205_vm1, %v204_v0  ;;  %s207_s0 = smov 112  }
   0x2   :  { %v14_v2 = vld [vmem:[%s245_s1] sm:$0xff]  ;;  %189 = vmatpush3.msra.mxu0 %v16_v1  ;;  %203 = vset.pattern.permute.xlu0 %v206_v4  ;;  %s208_s1 = smov 120  }
   0x3   :  { %v15_v3 = vld [vmem:[%s246_s2] sm:$0xff]  ;;  %191 = vmatmul.mubr.msk.f32.vlgmr.msra.gmra.mrb[0].mxu0 %vm22_vm0, %v14_v2  ;;  %193 = vmatprep.subr.mxu1 %v204_v0 }
   0x4   :  { %19 = vperm.xlu0 %203, %v15_v3   ;;  %195 = vmatprep.mubr.msk.f32.mxu1 %vm205_vm1, %v204_v0 }
  0x83   :  { %v20_v5 = vpop.permute.xlu0 %19 }
  0xd6   :  { %v92_v6 = vpop.f32.mrb[0].mxu0 }
  0xd7   :  { %v93_v7 = vadd.f32 %v92_v6, %v20_v5  ;;  %v192_v8 = vpop.f32.mrb[1].mxu0 }
  0xd9   :  { %v96_v9 = vmax.f32 %v93_v7, 0.0 }
  0xdb   :  { %102 = vrot.lane.b32.xlu1 %v96_v9, %s207_s0  ;;  %98 = vrot.lane.b32.xlu0 %v96_v9, %s208_s1 }
 0x14d   :  { %v99_v10 = vpop.permute.xlu0 %98  ;;  %v103_v12 = vpop.permute.xlu1 %102 }
 0x14e   :  { %v101_v11 = vadd.f32 %v99_v10, %v96_v9 }
 0x150   :  { %v105_v13 = vadd.f32 %v103_v12, %v101_v11 }
 0x152   :  { %194 = vmatpush3.msra.mxu1 %v105_v13 }
 0x153   :  { %196 = vmatmul.mubr.msk.f32.vlgmr.msra.gmra.mrb[0].mxu1 %vm22_vm0, %v14_v2 }
 0x226   :  { %v172_v14 = vpop.f32.mrb[0].mxu1 }
 0x227   :  { %v173_v15 = vadd.f32 %v172_v14, %v20_v5  ;;  %v197_v16 = vpop.f32.mrb[1].mxu1 }
 0x229   :  { %v176_v17 = vmax.f32 %v173_v15, 0.0 }
 0x22b   :  { %177 = vst.msk [vmem:[%s247_s3] sm:$0xff] %vm22_vm0, %v176_v17 }

</bundles_post_ra>
